<compile_context>
chip_gen: v6e
topology: v6e:2x2x1
jax: 0.10.0
libtpu: 0.0.40
codegen_flags: <defaults>
</compile_context>

<pallas_src>
import jax
import jax.numpy as jnp
from jax.experimental import pallas as pl
from jax.experimental.pallas import tpu as pltpu

NUM_EMBEDDINGS = 2000
EMB_DIM = 32
SEQ = 50                          # 50 * 32 = 1600 (input of first Linear)
IN_DIM = SEQ * EMB_DIM            # 1600
SEQ_PAD = 52                      # 52 * 32 = 1664 = 13 * 128 (clean K tiling)
IN_PAD = SEQ_PAD * EMB_DIM        # 1664
HIDDEN = 256
NUM_CLASSES = 10
CLS_PAD = 128                     # lane-dense output width
PAD_TOK = NUM_EMBEDDINGS          # extra zero row appended to the stored table


def _round_up(n, m):
    return ((n + m - 1) // m) * m


def _tpu_generation():
    """Best-effort TPU generation detection (5 / 6 / 7); defaults to 6."""
    try:
        kind = jax.devices()[0].device_kind.lower()
    except Exception:
        return 6
    if "v4" in kind or "v5" in kind:
        return 5                   # conservative tile cap for v4/v5e/v5p
    if "7" in kind:
        return 7
    return 6


def _pick_tm(batch, gen):
    """Generation-aware, waste-minimizing batch tile.

      * gen<=5: cap TM at 128 (256x256 f32 h tile = whole vreg file on v5e)
      * gen>=6: up to 512 (bigger tiles amortize ~0.35us per grid step)
      * gen==7: keep >= 2 grid steps when batch allows, so the "parallel"
        batch axis can shard across the chip's two TensorCores
      * among allowed tiles, minimize B_pad - B; prefer larger TM on ties
    """
    b8 = _round_up(max(batch, 1), 8)
    tm_max = 128 if gen <= 5 else 512
    if gen >= 7 and b8 >= 16:
        tm_max = min(tm_max, _round_up((b8 + 1) // 2, 8))
    cands = [t for t in (512, 256, 128) if t <= tm_max]
    small = min(b8, tm_max)
    if not cands or small < min(cands):
        cands.append(small)
    best_tm, best_waste = None, None
    for t in cands:
        waste = _round_up(b8, t) - batch
        if (best_waste is None or waste < best_waste
                or (waste == best_waste and t > best_tm)):
            best_tm, best_waste = t, waste
    return best_tm


def _mlp_softmax_kernel(x_ref, w1_ref, b1_ref, w2_ref, b2_ref, o_ref):
    # x_ref:  (TM, 1664) bf16    w1_ref: (1664, 256) bf16   b1_ref: (1, 256) f32
    # w2_ref: (256, 128)  bf16   b2_ref: (1, 128) f32       o_ref:  (TM, 128) f32

    # Linear(1600, 256): bf16 inputs, f32 MXU accumulation; bias + ReLU in f32.
    h = jnp.dot(x_ref[...], w1_ref[...], preferred_element_type=jnp.float32)
    h = jnp.maximum(h + b1_ref[...], 0.0)

    # Linear(256, 10) padded to 128 output lanes (zero weight cols; -1e30 bias
    # on the pad lanes so softmax gives them exactly 0 probability).
    logits = jnp.dot(h.astype(jnp.bfloat16), w2_ref[...],
                     preferred_element_type=jnp.float32) + b2_ref[...]

    # Numerically-stable softmax over the (padded) class axis.
    m = jnp.max(logits, axis=-1, keepdims=True)
    e = jnp.exp(logits - m)
    denom = jnp.sum(e, axis=-1, keepdims=True)
    o_ref[...] = e * pl.reciprocal(denom, approx=True)     # divide on the EUP


def employment_forward(x_idx, params):
    """x_idx: (B, SEQ) int32 token ids in [0, 2000). Returns (B, 10) f32 probs."""
    emb, w1, b1, w2, b2 = (params["emb"], params["w1"], params["b1"],
                           params["w2"], params["b2"])
    B = x_idx.shape[0]

    gen = _tpu_generation()
    TM = _pick_tm(B, gen)
    B_pad = _round_up(B, TM)

    # Pad the *indices* (batch -> B_pad rows, seq 50 -> 52 cols) with the
    # zero-row pad token; jnp.take then directly produces the kernel-ready
    # (B_pad, 1664) bf16 slab -- no separate activation pad copy in HBM.
    idx = jnp.pad(x_idx, ((0, B_pad - B), (0, SEQ_PAD - SEQ)),
                  constant_values=PAD_TOK)
    x = jnp.take(emb, idx.reshape(-1), axis=0).reshape(B_pad, IN_PAD)
    # TODO(synk): fuse the gather into the kernel (VMEM-resident 125 KiB table
    # + scalar-prefetched indices) once Mosaic has an efficient vector gather;
    # today TM*52 scalar-indexed row loads would be scalar-slot bound.

    out = pl.pallas_call(
        _mlp_softmax_kernel,
        out_shape=jax.ShapeDtypeStruct((B_pad, CLS_PAD), jnp.float32),
        grid=(B_pad // TM,),
        in_specs=[
            pl.BlockSpec((TM, IN_PAD), lambda i: (i, 0)),        # activations: streamed
            # Weights/biases: constant index_map => fetched once, VMEM-resident
            # (~1 MiB incl. double buffers; immaterial under the 16 MiB cap).
            # TODO(synk): single-buffer these via pipeline_mode=pl.Buffered(1)
            # once that path is verified on the deployed jax/Mosaic version.
            pl.BlockSpec((IN_PAD, HIDDEN), lambda i: (0, 0)),    # w1: resident
            pl.BlockSpec((1, HIDDEN), lambda i: (0, 0)),         # b1: resident
            pl.BlockSpec((HIDDEN, CLS_PAD), lambda i: (0, 0)),   # w2: resident
            pl.BlockSpec((1, CLS_PAD), lambda i: (0, 0)),        # b2: resident
        ],
        out_specs=pl.BlockSpec((TM, CLS_PAD), lambda i: (i, 0)),
        compiler_params=pltpu.CompilerParams(
            dimension_semantics=("parallel",),
            vmem_limit_bytes=16 << 20,
        ),
    )(x, w1, b1, w2, b2)

    return out[:B, :NUM_CLASSES]


def init_params(key):
    k_emb, k_w1, k_b1, k_w2, k_b2 = jax.random.split(key, 5)
    # Deterministic synthetic init (mimics PyTorch's uniform fan-in init).
    emb = jax.random.normal(k_emb, (NUM_EMBEDDINGS, EMB_DIM), jnp.float32)

    lim1 = 1.0 / jnp.sqrt(IN_DIM)
    w1 = jax.random.uniform(k_w1, (IN_DIM, HIDDEN), jnp.float32, -lim1, lim1)
    b1 = jax.random.uniform(k_b1, (1, HIDDEN), jnp.float32, -lim1, lim1)

    lim2 = 1.0 / jnp.sqrt(HIDDEN)
    w2 = jax.random.uniform(k_w2, (HIDDEN, NUM_CLASSES), jnp.float32, -lim2, lim2)
    b2 = jax.random.uniform(k_b2, (1, NUM_CLASSES), jnp.float32, -lim2, lim2)

    # Kernel-friendly storage:
    #  * emb / w1 / w2 in bf16 (weight-DMA is the bottleneck at small B)
    #  * emb gets one extra zero row (pad token 2000) so index padding alone
    #    produces the zero-padded activation slab
    #  * w1 K-padded 1600 -> 1664 with zero rows
    #  * w2 class-padded 10 -> 128 with zero cols; b2 pad lanes = -1e30
    emb_p = jnp.zeros((NUM_EMBEDDINGS + 1, EMB_DIM), jnp.bfloat16).at[
        :NUM_EMBEDDINGS].set(emb.astype(jnp.bfloat16))
    w1_p = jnp.zeros((IN_PAD, HIDDEN), jnp.bfloat16).at[:IN_DIM].set(
        w1.astype(jnp.bfloat16))
    w2_p = jnp.zeros((HIDDEN, CLS_PAD), jnp.bfloat16).at[:, :NUM_CLASSES].set(
        w2.astype(jnp.bfloat16))
    b2_p = jnp.full((1, CLS_PAD), -1e30, jnp.float32).at[:, :NUM_CLASSES].set(b2)

    return {"emb": emb_p, "w1": w1_p, "b1": b1, "w2": w2_p, "b2": b2_p}


if __name__ == "__main__":
    key = jax.random.PRNGKey(0)
    k_params, k_x = jax.random.split(key)
    params = init_params(k_params)

    B = 2
    x_idx = jax.random.randint(k_x, (B, SEQ), 0, NUM_EMBEDDINGS, dtype=jnp.int32)

    fwd = jax.jit(employment_forward)
    out = jax.block_until_ready(fwd(x_idx, params))

    # sanity: shape + softmax rows sum to ~1 (approx reciprocal => loose tol)
    assert out.shape == (B, NUM_CLASSES)
    assert bool(jnp.allclose(jnp.sum(out, axis=-1), 1.0, atol=1e-2))

    # reference check in plain JAX (same bf16-stored params, f32 math)
    embf = params["emb"][:NUM_EMBEDDINGS].astype(jnp.float32)
    w1f = params["w1"][:IN_DIM].astype(jnp.float32)
    b1f = params["b1"]
    w2f = params["w2"][:, :NUM_CLASSES].astype(jnp.float32)
    b2f = params["b2"][:, :NUM_CLASSES]
    flat = jnp.take(embf, x_idx.reshape(-1), axis=0).reshape(B, IN_DIM)
    h = jnp.maximum(flat @ w1f + b1f, 0.0)
    ref = jax.nn.softmax(h @ w2f + b2f, axis=-1)
    assert bool(jnp.allclose(out, ref, atol=2e-2))

    print("KERNEL_OK")
</pallas_src>

<mosaic_0001>
module attributes {stable_mosaic.version = 11 : i64} {
  func.func @_mlp_softmax_kernel(%arg0: i32, %arg1: memref<8x1664xbf16, #tpu.memory_space<vmem>>, %arg2: memref<1664x256xbf16, #tpu.memory_space<vmem>>, %arg3: memref<1x256xf32, #tpu.memory_space<vmem>>, %arg4: memref<256x128xbf16, #tpu.memory_space<vmem>>, %arg5: memref<1x128xf32, #tpu.memory_space<vmem>>, %arg6: memref<8x128xf32, #tpu.memory_space<vmem>>) attributes {dimension_semantics = [#tpu.dimension_semantics<parallel>], iteration_bounds = array<i64: 1>, scalar_prefetch = 0 : i64, scratch_operands = 0 : i64, tpu.core_type = #tpu.core_type<tc>, window_params = [{transform_indices = @transform_0, window_bounds = array<i64: 8, 1664>}, {pipeline_mode = #tpu.pipeline_mode<synchronous>, transform_indices = @transform_1, window_bounds = array<i64: 1664, 256>}, {pipeline_mode = #tpu.pipeline_mode<synchronous>, transform_indices = @transform_2, window_bounds = array<i64: 1, 256>}, {pipeline_mode = #tpu.pipeline_mode<synchronous>, transform_indices = @transform_3, window_bounds = array<i64: 256, 128>}, {pipeline_mode = #tpu.pipeline_mode<synchronous>, transform_indices = @transform_4, window_bounds = array<i64: 1, 128>}, {transform_indices = @transform_5, window_bounds = array<i64: 8, 128>}]} {
    %c0 = arith.constant 0 : index
    %c0_0 = arith.constant 0 : index
    %0 = vector.load %arg1[%c0, %c0_0] : memref<8x1664xbf16, #tpu.memory_space<vmem>>, vector<8x1664xbf16>
    %c0_1 = arith.constant 0 : index
    %c0_2 = arith.constant 0 : index
    %1 = vector.load %arg2[%c0_1, %c0_2] : memref<1664x256xbf16, #tpu.memory_space<vmem>>, vector<1664x256xbf16>
    %cst = arith.constant dense<0.000000e+00> : vector<8x256xf32>
    %2 = tpu.matmul %0, %1, %cst {dimension_numbers = #tpu.dot_dimension_numbers<[1], [0], [0], [1], [0, 0, 1, 1], [], []>} : vector<8x1664xbf16>, vector<1664x256xbf16>, vector<8x256xf32> -> vector<8x256xf32>
    %c0_3 = arith.constant 0 : index
    %c0_4 = arith.constant 0 : index
    %3 = vector.load %arg3[%c0_3, %c0_4] : memref<1x256xf32, #tpu.memory_space<vmem>>, vector<1x256xf32>
    %4 = vector.broadcast %3 : vector<1x256xf32> to vector<8x256xf32>
    %5 = arith.addf %2, %4 : vector<8x256xf32>
    %cst_5 = arith.constant 0.000000e+00 : f32
    %6 = vector.broadcast %cst_5 : f32 to vector<8x256xf32>
    %7 = arith.maximumf %5, %6 : vector<8x256xf32>
    %8 = arith.truncf %7 : vector<8x256xf32> to vector<8x256xbf16>
    %c0_6 = arith.constant 0 : index
    %c0_7 = arith.constant 0 : index
    %9 = vector.load %arg4[%c0_6, %c0_7] : memref<256x128xbf16, #tpu.memory_space<vmem>>, vector<256x128xbf16>
    %cst_8 = arith.constant dense<0.000000e+00> : vector<8x128xf32>
    %10 = tpu.matmul %8, %9, %cst_8 {dimension_numbers = #tpu.dot_dimension_numbers<[1], [0], [0], [1], [0, 0, 1, 1], [], []>} : vector<8x256xbf16>, vector<256x128xbf16>, vector<8x128xf32> -> vector<8x128xf32>
    %c0_9 = arith.constant 0 : index
    %c0_10 = arith.constant 0 : index
    %11 = vector.load %arg5[%c0_9, %c0_10] : memref<1x128xf32, #tpu.memory_space<vmem>>, vector<1x128xf32>
    %12 = vector.broadcast %11 : vector<1x128xf32> to vector<8x128xf32>
    %13 = arith.addf %10, %12 : vector<8x128xf32>
    %cst_11 = arith.constant dense<0xFF800000> : vector<8xf32>
    %14 = vector.multi_reduction <maximumf>, %13, %cst_11 [1] : vector<8x128xf32> to vector<8xf32>
    %15 = vector.shape_cast %14 : vector<8xf32> to vector<8x1xf32>
    %16 = vector.broadcast %15 : vector<8x1xf32> to vector<8x128xf32>
    %17 = arith.subf %13, %16 : vector<8x128xf32>
    %18 = math.exp %17 : vector<8x128xf32>
    %cst_12 = arith.constant dense<0.000000e+00> : vector<8xf32>
    %19 = vector.multi_reduction <add>, %18, %cst_12 [1] : vector<8x128xf32> to vector<8xf32>
    %20 = vector.shape_cast %19 : vector<8xf32> to vector<8x1xf32>
    %21 = tpu.reciprocal %20 {approx = true} : vector<8x1xf32> -> vector<8x1xf32>
    %22 = vector.broadcast %21 : vector<8x1xf32> to vector<8x128xf32>
    %23 = arith.mulf %18, %22 : vector<8x128xf32>
    %c0_13 = arith.constant 0 : index
    %c0_14 = arith.constant 0 : index
    %24 = vector.load %arg6[%c0_13, %c0_14] : memref<8x128xf32, #tpu.memory_space<vmem>>, vector<8x128xf32>
    tpu.vector_store %arg6[%c0_13, %c0_14], %23 {strides = array<i32>} : memref<8x128xf32, #tpu.memory_space<vmem>>, vector<8x128xf32>,
    return
  }
  func.func @transform_0(%arg0: i32) -> (i32, i32) {
    %c0_i32 = arith.constant 0 : i32
    %c0_i32_0 = arith.constant 0 : i32
    return %arg0, %c0_i32 : i32, i32
  }
  func.func @transform_1(%arg0: i32) -> (i32, i32) {
    %c0_i32 = arith.constant 0 : i32
    %c0_i32_0 = arith.constant 0 : i32
    %c0_i32_1 = arith.constant 0 : i32
    return %c0_i32, %c0_i32_0 : i32, i32
  }
  func.func @transform_2(%arg0: i32) -> (i32, i32) {
    %c0_i32 = arith.constant 0 : i32
    %c0_i32_0 = arith.constant 0 : i32
    %c0_i32_1 = arith.constant 0 : i32
    return %c0_i32, %c0_i32_0 : i32, i32
  }
  func.func @transform_3(%arg0: i32) -> (i32, i32) {
    %c0_i32 = arith.constant 0 : i32
    %c0_i32_0 = arith.constant 0 : i32
    %c0_i32_1 = arith.constant 0 : i32
    return %c0_i32, %c0_i32_0 : i32, i32
  }
  func.func @transform_4(%arg0: i32) -> (i32, i32) {
    %c0_i32 = arith.constant 0 : i32
    %c0_i32_0 = arith.constant 0 : i32
    %c0_i32_1 = arith.constant 0 : i32
    return %c0_i32, %c0_i32_0 : i32, i32
  }
  func.func @transform_5(%arg0: i32) -> (i32, i32) {
    %c0_i32 = arith.constant 0 : i32
    %c0_i32_0 = arith.constant 0 : i32
    return %arg0, %c0_i32 : i32, i32
  }
}

</mosaic_0001>

<bundles_post_ra>
// kernel: employment_forward.1
= control target key start
LH: loop header
LB: loop body
LE: loop exit
PB: predicated region body
PF: predicated region fallthrough
CT: control target
= control target key end

     0   :  { %s3177_s1 = inlined_call_operand.vmem [shape: bf16[1664,256], index: 1, kind: input, shape index: {}]   ;;  %s3178_s0 = inlined_call_operand.vmem [shape: bf16[8,1664], index: 0, kind: input, shape index: {}]   ;;  %s3179_s2 = inlined_call_operand.vmem [shape: f32[1,256], index: 2, kind: input, shape index: {}]   ;;  %s3180_s3 = inlined_call_operand.vmem [shape: bf16[256,128], index: 3, kind: input, shape index: {}]   ;;  %s3181_s4 = inlined_call_operand.vmem [shape: f32[1,128], index: 4, kind: input, shape index: {}]   ;;  %s3182_s5 = inlined_call_operand.vmem [shape: f32[8,128], index: 5, kind: output, shape index: {}]  }
   0x1   :  { %v2075_v0 = vld [vmem:[%s3177_s1 + $0x74] ss:$8 sps:$4 sm:$0xff]   ;;  %v2077_v1 = vld [vmem:[%s3177_s1 + $0x70] ss:$8 sps:$4 sm:$0xff]   ;;  %v2081_v4 = vld [vmem:[%s3177_s1 + $0x64] ss:$8 sps:$4 sm:$0xff]  }
   0x2   :  { %1334 = vmatprep.subr.bf16.mxu0 %v2075_v0  ;;  %v2078_v2 = vld [vmem:[%s3177_s1 + $0x174] ss:$8 sps:$4 sm:$0xff]   ;;  %v2080_v3 = vld [vmem:[%s3177_s1 + $0x170] ss:$8 sps:$4 sm:$0xff]   ;;  %v2083_v5 = vld [vmem:[%s3177_s1 + $0x60] ss:$8 sps:$4 sm:$0xff]  }
   0x3   :  { %1335 = vmatpush1.bf16.msra.mxu0 %v2077_v1  ;;  %1375 = vmatprep.subr.bf16.mxu1 %v2078_v2  ;;  %v2084_v6 = vld [vmem:[%s3177_s1 + $0x164] ss:$8 sps:$4 sm:$0xff]   ;;  %v2086_v7 = vld [vmem:[%s3177_s1 + $0x160] ss:$8 sps:$4 sm:$0xff]   ;;  %v2087_v8 = vld [vmem:[%s3177_s1 + $0x54] ss:$8 sps:$4 sm:$0xff]  }
   0x4   :  { %1376 = vmatpush1.bf16.msra.mxu1 %v2080_v3  ;;  %1336 = vmatprep.subr.bf16.mxu0 %v2081_v4  ;;  %v2089_v9 = vld [vmem:[%s3177_s1 + $0x50] ss:$8 sps:$4 sm:$0xff]   ;;  %v2090_v10 = vld [vmem:[%s3177_s1 + $0x154] ss:$8 sps:$4 sm:$0xff]   ;;  %v2093_v11 = vld [vmem:[%s3177_s1 + $0x44] ss:$8 sps:$4 sm:$0xff]  }
   0x5   :  { %1377 = vmatprep.subr.bf16.mxu1 %v2084_v6  ;;  %v2092_v12 = vld [vmem:[%s3177_s1 + $0x150] ss:$8 sps:$4 sm:$0xff]   ;;  %v2096_v13 = vld [vmem:[%s3177_s1 + $0x144] ss:$8 sps:$4 sm:$0xff]   ;;  %v2095_v14 = vld [vmem:[%s3177_s1 + $0x40] ss:$8 sps:$4 sm:$0xff]  }
   0x6   :  { %v2099_v15 = vld [vmem:[%s3177_s1 + $0x34] ss:$8 sps:$4 sm:$0xff]   ;;  %v2098_v16 = vld [vmem:[%s3177_s1 + $0x140] ss:$8 sps:$4 sm:$0xff]   ;;  %v2101_v18 = vld [vmem:[%s3177_s1 + $0x30] ss:$8 sps:$4 sm:$0xff]  }
   0x7   :  { %1337 = vmatpush1.bf16.msra.mxu0 %v2083_v5  ;;  %v2102_v17 = vld [vmem:[%s3177_s1 + $0x134] ss:$8 sps:$4 sm:$0xff]   ;;  %v2105_v19 = vld [vmem:[%s3177_s1 + $0x24] ss:$8 sps:$4 sm:$0xff]   ;;  %v2104_v20 = vld [vmem:[%s3177_s1 + $0x130] ss:$8 sps:$4 sm:$0xff]  }
   0x8   :  { %1338 = vmatprep.subr.bf16.mxu0 %v2087_v8  ;;  %1378 = vmatpush1.bf16.msra.mxu1 %v2086_v7  ;;  %v2108_v21 = vld [vmem:[%s3177_s1 + $0x124] ss:$8 sps:$4 sm:$0xff]   ;;  %v2107_v22 = vld [vmem:[%s3177_s1 + $0x20] ss:$8 sps:$4 sm:$0xff]   ;;  %v2111_v23 = vld [vmem:[%s3177_s1 + $0x14] ss:$8 sps:$4 sm:$0xff]  }
   0x9   :  { %1379 = vmatprep.subr.bf16.mxu1 %v2090_v10  ;;  %v2110_v24 = vld [vmem:[%s3177_s1 + $0x120] ss:$8 sps:$4 sm:$0xff]   ;;  %v2114_v25 = vld [vmem:[%s3177_s1 + $0x114] ss:$8 sps:$4 sm:$0xff]   ;;  %v2113_v26 = vld [vmem:[%s3177_s1 + $0x10] ss:$8 sps:$4 sm:$0xff]  }
   0xa   :  { %v2117_v27 = vld [vmem:[%s3177_s1 + $0x4] ss:$8 sps:$4 sm:$0xff]   ;;  %v2116_v28 = vld [vmem:[%s3177_s1 + $0x110] ss:$8 sps:$4 sm:$0xff]   ;;  %v2119_v30 = vld [vmem:[%s3177_s1] ss:$8 sps:$4 sm:$0xff]  }
   0xb   :  { %1339 = vmatpush1.bf16.msra.mxu0 %v2089_v9  ;;  %v2120_v29 = vld [vmem:[%s3177_s1 + $0x104] ss:$8 sps:$4 sm:$0xff]   ;;  %v2123_v31 = vld [vmem:[%s3177_s1 + $0xf4] ss:$8 sps:$4 sm:$0xff]   ;;  %v2122_v32 = vld [vmem:[%s3177_s1 + $0x100] ss:$8 sps:$4 sm:$0xff]  }
   0xc   :  { %1340 = vmatprep.subr.bf16.mxu0 %v2093_v11  ;;  %1380 = vmatpush1.bf16.msra.mxu1 %v2092_v12  ;;  %v2126_v33 = vld [vmem:[%s3177_s1 + $0x1f4] ss:$8 sps:$4 sm:$0xff]   ;;  %v2125_v34 = vld [vmem:[%s3177_s1 + $0xf0] ss:$8 sps:$4 sm:$0xff]   ;;  %v2129_v35 = vld [vmem:[%s3177_s1 + $0xe4] ss:$8 sps:$4 sm:$0xff]  }
   0xd   :  { %1381 = vmatprep.subr.bf16.mxu1 %v2096_v13  ;;  %v2128_v36 = vld [vmem:[%s3177_s1 + $0x1f0] ss:$8 sps:$4 sm:$0xff]   ;;  %v2132_v37 = vld [vmem:[%s3177_s1 + $0x1e4] ss:$8 sps:$4 sm:$0xff]   ;;  %v2131_v38 = vld [vmem:[%s3177_s1 + $0xe0] ss:$8 sps:$4 sm:$0xff]  }
   0xe   :  { %v2135_v39 = vld [vmem:[%s3177_s1 + $0xd4] ss:$8 sps:$4 sm:$0xff]   ;;  %v2134_v40 = vld [vmem:[%s3177_s1 + $0x1e0] ss:$8 sps:$4 sm:$0xff]   ;;  %v2137_v42 = vld [vmem:[%s3177_s1 + $0xd0] ss:$8 sps:$4 sm:$0xff]  }
   0xf   :  { %1341 = vmatpush1.bf16.msra.mxu0 %v2095_v14  ;;  %v2138_v41 = vld [vmem:[%s3177_s1 + $0x1d4] ss:$8 sps:$4 sm:$0xff]   ;;  %v2141_v43 = vld [vmem:[%s3177_s1 + $0xc4] ss:$8 sps:$4 sm:$0xff]   ;;  %v2140_v44 = vld [vmem:[%s3177_s1 + $0x1d0] ss:$8 sps:$4 sm:$0xff]  }
  0x10   :  { %1342 = vmatprep.subr.bf16.mxu0 %v2099_v15  ;;  %1382 = vmatpush1.bf16.msra.mxu1 %v2098_v16  ;;  %v2144_v45 = vld [vmem:[%s3177_s1 + $0x1c4] ss:$8 sps:$4 sm:$0xff]   ;;  %v2143_v47 = vld [vmem:[%s3177_s1 + $0xc0] ss:$8 sps:$4 sm:$0xff]   ;;  %v2147_v49 = vld [vmem:[%s3177_s1 + $0xb4] ss:$8 sps:$4 sm:$0xff]  }
  0x11   :  { %1383 = vmatprep.subr.bf16.mxu1 %v2102_v17  ;;  %v21_v46 = vld [vmem:[%s3178_s0] sm:$0xff]  ;;  %v22_v50 = vld [vmem:[%s3178_s0 + $0x8] sm:$0xff]  ;;  %v2150_v53 = vld [vmem:[%s3177_s1 + $0x1b4] ss:$8 sps:$4 sm:$0xff]  }
  0x12   :  { %v1815_v48 = vcombine.high %v21_v46, %v21_v46  ;;  %v2146_v51 = vld [vmem:[%s3177_s1 + $0x1c0] ss:$8 sps:$4 sm:$0xff]   ;;  %v1817_v52 = vcombine.high %v22_v50, %v22_v50  ;;  %v2149_v54 = vld [vmem:[%s3177_s1 + $0xb0] ss:$8 sps:$4 sm:$0xff]   ;;  %v2153_v55 = vld [vmem:[%s3177_s1 + $0xa4] ss:$8 sps:$4 sm:$0xff]   ;;  %v1814_v5 = vcombine.low %v21_v46, %v21_v46  ;;  %v1816_v8 = vcombine.low %v22_v50, %v22_v50 }
  0x13   :  { %1343 = vmatpush1.bf16.msra.mxu0 %v2101_v18  ;;  %v2152_v56 = vld [vmem:[%s3177_s1 + $0x1b0] ss:$8 sps:$4 sm:$0xff]   ;;  %v2156_v57 = vld [vmem:[%s3177_s1 + $0x1a4] ss:$8 sps:$4 sm:$0xff]   ;;  %v2155_v58 = vld [vmem:[%s3177_s1 + $0xa0] ss:$8 sps:$4 sm:$0xff]  }
  0x14   :  { %1344 = vmatprep.subr.bf16.mxu0 %v2105_v19  ;;  %1384 = vmatpush1.bf16.msra.mxu1 %v2104_v20  ;;  %v2159_v59 = vld [vmem:[%s3177_s1 + $0x94] ss:$8 sps:$4 sm:$0xff]   ;;  %v2158_v60 = vld [vmem:[%s3177_s1 + $0x1a0] ss:$8 sps:$4 sm:$0xff]   ;;  %v2161_v62 = vld [vmem:[%s3177_s1 + $0x90] ss:$8 sps:$4 sm:$0xff]  }
  0x15   :  { %1385 = vmatprep.subr.bf16.mxu1 %v2108_v21  ;;  %1366 = vmatprep.mubr.bf16.mxu0 %v1815_v48  ;;  %v2162_v61 = vld [vmem:[%s3177_s1 + $0x194] ss:$8 sps:$4 sm:$0xff]   ;;  %v2165_v63 = vld [vmem:[%s3177_s1 + $0x84] ss:$8 sps:$4 sm:$0xff]   ;;  %v2164_v0 = vld [vmem:[%s3177_s1 + $0x190] ss:$8 sps:$4 sm:$0xff]  }
  0x16   :  { %1407 = vmatprep.mubr.bf16.mxu1 %v1817_v52  ;;  %v2168_v1 = vld [vmem:[%s3177_s1 + $0x184] ss:$8 sps:$4 sm:$0xff]   ;;  %v2167_v2 = vld [vmem:[%s3177_s1 + $0x80] ss:$8 sps:$4 sm:$0xff]   ;;  %v2175_v3 = vld [vmem:[%s3177_s1 + $0x274] ss:$8 sps:$4 sm:$0xff]  }
  0x17   :  { %1345 = vmatpush1.bf16.msra.mxu0 %v2107_v22  ;;  %v2172_v4 = vld [vmem:[%s3177_s1 + $0x180] ss:$8 sps:$4 sm:$0xff]   ;;  %v2180_v6 = vld [vmem:[%s3177_s1 + $0x374] ss:$8 sps:$4 sm:$0xff]   ;;  %v2173_v7 = vld [vmem:[%s3177_s1 + $0x270] ss:$8 sps:$4 sm:$0xff]  }
  0x18   :  { %1346 = vmatprep.subr.bf16.mxu0 %v2111_v23  ;;  %1386 = vmatpush1.bf16.msra.mxu1 %v2110_v24  ;;  %v2183_v9 = vld [vmem:[%s3177_s1 + $0x264] ss:$8 sps:$4 sm:$0xff]   ;;  %v2178_v10 = vld [vmem:[%s3177_s1 + $0x370] ss:$8 sps:$4 sm:$0xff]   ;;  %v2181_v12 = vld [vmem:[%s3177_s1 + $0x260] ss:$8 sps:$4 sm:$0xff]  }
  0x19   :  { %1387 = vmatprep.subr.bf16.mxu1 %v2114_v25  ;;  %v2186_v11 = vld [vmem:[%s3177_s1 + $0x364] ss:$8 sps:$4 sm:$0xff]   ;;  %v2189_v13 = vld [vmem:[%s3177_s1 + $0x254] ss:$8 sps:$4 sm:$0xff]   ;;  %v2184_v14 = vld [vmem:[%s3177_s1 + $0x360] ss:$8 sps:$4 sm:$0xff]  }
  0x1a   :  { %v2192_v15 = vld [vmem:[%s3177_s1 + $0x354] ss:$8 sps:$4 sm:$0xff]   ;;  %v2187_v16 = vld [vmem:[%s3177_s1 + $0x250] ss:$8 sps:$4 sm:$0xff]   ;;  %v2195_v17 = vld [vmem:[%s3177_s1 + $0x244] ss:$8 sps:$4 sm:$0xff]  }
  0x1b   :  { %1347 = vmatpush1.bf16.msra.mxu0 %v2113_v26  ;;  %v2190_v18 = vld [vmem:[%s3177_s1 + $0x350] ss:$8 sps:$4 sm:$0xff]   ;;  %v2198_v19 = vld [vmem:[%s3177_s1 + $0x344] ss:$8 sps:$4 sm:$0xff]   ;;  %v2193_v20 = vld [vmem:[%s3177_s1 + $0x240] ss:$8 sps:$4 sm:$0xff]  }
  0x1c   :  { %1348 = vmatprep.subr.bf16.mxu0 %v2117_v27  ;;  %1388 = vmatpush1.bf16.msra.mxu1 %v2116_v28  ;;  %v2201_v21 = vld [vmem:[%s3177_s1 + $0x234] ss:$8 sps:$4 sm:$0xff]   ;;  %v2196_v22 = vld [vmem:[%s3177_s1 + $0x340] ss:$8 sps:$4 sm:$0xff]   ;;  %v2199_v24 = vld [vmem:[%s3177_s1 + $0x230] ss:$8 sps:$4 sm:$0xff]  }
  0x1d   :  { %1389 = vmatprep.subr.bf16.mxu1 %v2120_v29  ;;  %v2204_v23 = vld [vmem:[%s3177_s1 + $0x334] ss:$8 sps:$4 sm:$0xff]   ;;  %v2207_v25 = vld [vmem:[%s3177_s1 + $0x224] ss:$8 sps:$4 sm:$0xff]   ;;  %v2202_v26 = vld [vmem:[%s3177_s1 + $0x330] ss:$8 sps:$4 sm:$0xff]  }
  0x1e   :  { %v2210_v27 = vld [vmem:[%s3177_s1 + $0x324] ss:$8 sps:$4 sm:$0xff]   ;;  %v2205_v28 = vld [vmem:[%s3177_s1 + $0x220] ss:$8 sps:$4 sm:$0xff]   ;;  %v2213_v29 = vld [vmem:[%s3177_s1 + $0x214] ss:$8 sps:$4 sm:$0xff]  }
  0x1f   :  { %1349 = vmatpush1.bf16.msra.mxu0 %v2119_v30  ;;  %v2208_v30 = vld [vmem:[%s3177_s1 + $0x320] ss:$8 sps:$4 sm:$0xff]   ;;  %v2226_v46 = vld [vmem:[%s3177_s1 + $0x3f0] ss:$8 sps:$4 sm:$0xff]  }
  0x20   :  { %1350 = vmatprep.subr.bf16.mxu0 %v2123_v31  ;;  %1390 = vmatpush1.bf16.msra.mxu1 %v2122_v32  ;;  %v2216_v31 = vld [vmem:[%s3177_s1 + $0x314] ss:$8 sps:$4 sm:$0xff]   ;;  %v2229_v48 = vld [vmem:[%s3177_s1 + $0x2e0] ss:$8 sps:$4 sm:$0xff]   ;;  %v2235_v52 = vld [vmem:[%s3177_s1 + $0x2d0] ss:$8 sps:$4 sm:$0xff]  }
  0x21   :  { %1391 = vmatprep.subr.bf16.mxu1 %v2126_v33  ;;  %v2730_v32 = vld [vmem:[%s3178_s0 + $0x10] sm:$0xff]  ;;  %v2232_v50 = vld [vmem:[%s3177_s1 + $0x3e0] ss:$8 sps:$4 sm:$0xff]  }
  0x22   :  { %v2211_v33 = vld [vmem:[%s3177_s1 + $0x210] ss:$8 sps:$4 sm:$0xff]  }
  0x23   :  { %1351 = vmatpush2.bf16.msra.mxu0 %v2125_v34  ;;  %v1819_v34 = vcombine.high %v2730_v32, %v2730_v32 }
  0x24   :  { %1352 = vmatprep.subr.bf16.mxu0 %v2129_v35  ;;  %1392 = vmatpush2.bf16.msra.mxu1 %v2128_v36  ;;  %v2740_v35 = vld [vmem:[%s3178_s0 + $0x18] sm:$0xff]  ;;  %v2219_v36 = vld [vmem:[%s3177_s1 + $0x204] ss:$8 sps:$4 sm:$0xff]  }
  0x25   :  { %1393 = vmatprep.subr.bf16.mxu1 %v2132_v37  ;;  %v1821_v37 = vcombine.high %v2740_v35, %v2740_v35 }
  0x27   :  { %1353 = vmatpush2.bf16.msra.mxu0 %v2131_v38  ;;  %v2214_v38 = vld [vmem:[%s3177_s1 + $0x310] ss:$8 sps:$4 sm:$0xff]  }
  0x28   :  { %1354 = vmatprep.subr.bf16.mxu0 %v2135_v39  ;;  %1394 = vmatpush2.bf16.msra.mxu1 %v2134_v40  ;;  %v2222_v39 = vld [vmem:[%s3177_s1 + $0x304] ss:$8 sps:$4 sm:$0xff]   ;;  %v2217_v40 = vld [vmem:[%s3177_s1 + $0x200] ss:$8 sps:$4 sm:$0xff]  }
  0x29   :  { %1395 = vmatprep.subr.bf16.mxu1 %v2138_v41  ;;  %v2225_v41 = vld [vmem:[%s3177_s1 + $0x2f4] ss:$8 sps:$4 sm:$0xff]  }
  0x2b   :  { %1355 = vmatpush2.bf16.msra.mxu0 %v2137_v42  ;;  %v2220_v42 = vld [vmem:[%s3177_s1 + $0x300] ss:$8 sps:$4 sm:$0xff]  }
  0x2c   :  { %1356 = vmatprep.subr.bf16.mxu0 %v2141_v43  ;;  %1396 = vmatpush2.bf16.msra.mxu1 %v2140_v44  ;;  %v2228_v43 = vld [vmem:[%s3177_s1 + $0x3f4] ss:$8 sps:$4 sm:$0xff]   ;;  %v2223_v44 = vld [vmem:[%s3177_s1 + $0x2f0] ss:$8 sps:$4 sm:$0xff]  }
  0x2d   :  { %1397 = vmatprep.subr.bf16.mxu1 %v2144_v45  ;;  %v2231_v45 = vld [vmem:[%s3177_s1 + $0x2e4] ss:$8 sps:$4 sm:$0xff]  }
  0x2f   :  { %1357 = vmatpush2.bf16.msra.mxu0 %v2143_v47  ;;  %v2234_v47 = vld [vmem:[%s3177_s1 + $0x3e4] ss:$8 sps:$4 sm:$0xff]  }
  0x30   :  { %1358 = vmatprep.subr.bf16.mxu0 %v2147_v49  ;;  %1398 = vmatpush2.bf16.msra.mxu1 %v2146_v51  ;;  %v2237_v49 = vld [vmem:[%s3177_s1 + $0x2d4] ss:$8 sps:$4 sm:$0xff]  }
  0x31   :  { %1399 = vmatprep.subr.bf16.mxu1 %v2150_v53  ;;  %v2240_v51 = vld [vmem:[%s3177_s1 + $0x3d4] ss:$8 sps:$4 sm:$0xff]   ;;  %v2243_v53 = vld [vmem:[%s3177_s1 + $0x2c4] ss:$8 sps:$4 sm:$0xff]  }
  0x33   :  { %1359 = vmatpush2.bf16.msra.mxu0 %v2149_v54  ;;  %v2238_v54 = vld [vmem:[%s3177_s1 + $0x3d0] ss:$8 sps:$4 sm:$0xff]  }
  0x34   :  { %1360 = vmatprep.subr.bf16.mxu0 %v2153_v55  ;;  %1400 = vmatpush2.bf16.msra.mxu1 %v2152_v56  ;;  %v2246_v55 = vld [vmem:[%s3177_s1 + $0x3c4] ss:$8 sps:$4 sm:$0xff]   ;;  %v2241_v56 = vld [vmem:[%s3177_s1 + $0x2c0] ss:$8 sps:$4 sm:$0xff]  }
  0x35   :  { %1401 = vmatprep.subr.bf16.mxu1 %v2156_v57  ;;  %v2249_v57 = vld [vmem:[%s3177_s1 + $0x2b4] ss:$8 sps:$4 sm:$0xff]  }
  0x37   :  { %1361 = vmatpush2.bf16.msra.mxu0 %v2155_v58  ;;  %v2244_v58 = vld [vmem:[%s3177_s1 + $0x3c0] ss:$8 sps:$4 sm:$0xff]  }
  0x38   :  { %1362 = vmatprep.subr.bf16.mxu0 %v2159_v59  ;;  %1402 = vmatpush2.bf16.msra.mxu1 %v2158_v60  ;;  %v2252_v59 = vld [vmem:[%s3177_s1 + $0x3b4] ss:$8 sps:$4 sm:$0xff]   ;;  %v2247_v60 = vld [vmem:[%s3177_s1 + $0x2b0] ss:$8 sps:$4 sm:$0xff]  }
  0x39   :  { %1403 = vmatprep.subr.bf16.mxu1 %v2162_v61  ;;  %v2255_v61 = vld [vmem:[%s3177_s1 + $0x2a4] ss:$8 sps:$4 sm:$0xff]  }
  0x3b   :  { %1363 = vmatpush2.bf16.msra.mxu0 %v2161_v62  ;;  %v2250_v62 = vld [vmem:[%s3177_s1 + $0x3b0] ss:$8 sps:$4 sm:$0xff]  }
  0x3c   :  { %1364 = vmatprep.subr.bf16.mxu0 %v2165_v63  ;;  %1404 = vmatpush2.bf16.msra.mxu1 %v2164_v0  ;;  %v2258_v63 = vld [vmem:[%s3177_s1 + $0x3a4] ss:$8 sps:$4 sm:$0xff]   ;;  %v2253_v0 = vld [vmem:[%s3177_s1 + $0x2a0] ss:$8 sps:$4 sm:$0xff]  }
  0x3d   :  { %1405 = vmatprep.subr.bf16.mxu1 %v2168_v1  ;;  %v2261_v1 = vld [vmem:[%s3177_s1 + $0x294] ss:$8 sps:$4 sm:$0xff]  }
  0x3f   :  { %1365 = vmatpush2.bf16.msra.mxu0 %v2167_v2  ;;  %v2256_v2 = vld [vmem:[%s3177_s1 + $0x3a0] ss:$8 sps:$4 sm:$0xff]  }
  0x40   :  { %1416 = vmatprep.subr.bf16.mxu0 %v2175_v3  ;;  %1406 = vmatpush2.bf16.msra.mxu1 %v2172_v4  ;;  %v2264_v3 = vld [vmem:[%s3177_s1 + $0x394] ss:$8 sps:$4 sm:$0xff]   ;;  %v2259_v4 = vld [vmem:[%s3177_s1 + $0x290] ss:$8 sps:$4 sm:$0xff]  }
  0x41   :  { %1457 = vmatprep.subr.bf16.mxu1 %v2180_v6  ;;  %v2262_v6 = vld [vmem:[%s3177_s1 + $0x390] ss:$8 sps:$4 sm:$0xff]  }
  0x42   :  { %1367 = vmatmul.mubr.bf16.vlgmr.msra.gmra.mxu0 %v1814_v5  ;;  %v2267_v5 = vld [vmem:[%s3177_s1 + $0x284] ss:$8 sps:$4 sm:$0xff]  }
  0x43   :  { %1417 = vmatpush1.bf16.msra.mxu0 %v2173_v7  ;;  %1408 = vmatmul.mubr.bf16.vlgmr.msra.gmra.mxu1 %v1816_v8  ;;  %v2270_v7 = vld [vmem:[%s3177_s1 + $0x384] ss:$8 sps:$4 sm:$0xff]   ;;  %v2265_v8 = vld [vmem:[%s3177_s1 + $0x280] ss:$8 sps:$4 sm:$0xff]  }
  0x44   :  { %1418 = vmatprep.subr.bf16.mxu0 %v2183_v9  ;;  %1458 = vmatpush1.bf16.msra.mxu1 %v2178_v10  ;;  %v2275_v9 = vld [vmem:[%s3177_s1 + $0x474] ss:$8 sps:$4 sm:$0xff]   ;;  %v2268_v10 = vld [vmem:[%s3177_s1 + $0x380] ss:$8 sps:$4 sm:$0xff]  }
  0x45   :  { %1459 = vmatprep.subr.bf16.mxu1 %v2186_v11  ;;  %1448 = vmatprep.mubr.bf16.mxu0 %v1819_v34  ;;  %v1818_v11 = vcombine.low %v2730_v32, %v2730_v32  ;;  %v2296_v32 = vld [vmem:[%s3177_s1 + $0x540] ss:$8 sps:$4 sm:$0xff]   ;;  %v2299_v34 = vld [vmem:[%s3177_s1 + $0x430] ss:$8 sps:$4 sm:$0xff]  }
  0x46   :  { %1489 = vmatprep.mubr.bf16.mxu1 %v1821_v37  ;;  %v2310_v37 = vld [vmem:[%s3177_s1 + $0x524] ss:$8 sps:$4 sm:$0xff]  }
  0x47   :  { %1419 = vmatpush1.bf16.msra.mxu0 %v2181_v12  ;;  %v2280_v12 = vld [vmem:[%s3177_s1 + $0x574] ss:$8 sps:$4 sm:$0xff]  }
  0x48   :  { %1420 = vmatprep.subr.bf16.mxu0 %v2189_v13  ;;  %1460 = vmatpush1.bf16.msra.mxu1 %v2184_v14  ;;  %v2273_v13 = vld [vmem:[%s3177_s1 + $0x470] ss:$8 sps:$4 sm:$0xff]   ;;  %v1820_v14 = vcombine.low %v2740_v35, %v2740_v35  ;;  %v2307_v35 = vld [vmem:[%s3177_s1 + $0x424] ss:$8 sps:$4 sm:$0xff]  }
  0x49   :  { %1461 = vmatprep.subr.bf16.mxu1 %v2192_v15  ;;  %v2283_v15 = vld [vmem:[%s3177_s1 + $0x464] ss:$8 sps:$4 sm:$0xff]  }
  0x4b   :  { %1421 = vmatpush1.bf16.msra.mxu0 %v2187_v16  ;;  %v2278_v16 = vld [vmem:[%s3177_s1 + $0x570] ss:$8 sps:$4 sm:$0xff]  }
  0x4c   :  { %1422 = vmatprep.subr.bf16.mxu0 %v2195_v17  ;;  %1462 = vmatpush1.bf16.msra.mxu1 %v2190_v18  ;;  %v2877_v17 = vld [vmem:[%s3178_s0 + $0x20] sm:$0xff] }
  0x4d   :  { %1463 = vmatprep.subr.bf16.mxu1 %v2198_v19  ;;  %v2281_v18 = vld [vmem:[%s3177_s1 + $0x460] ss:$8 sps:$4 sm:$0xff]   ;;  %v2286_v19 = vld [vmem:[%s3177_s1 + $0x564] ss:$8 sps:$4 sm:$0xff]  }
  0x4f   :  { %1423 = vmatpush1.bf16.msra.mxu0 %v2193_v20  ;;  %v1823_v20 = vcombine.high %v2877_v17, %v2877_v17 }
  0x50   :  { %1424 = vmatprep.subr.bf16.mxu0 %v2201_v21  ;;  %1464 = vmatpush1.bf16.msra.mxu1 %v2196_v22  ;;  %v2890_v21 = vld [vmem:[%s3178_s0 + $0x28] sm:$0xff]  ;;  %v2289_v22 = vld [vmem:[%s3177_s1 + $0x454] ss:$8 sps:$4 sm:$0xff]  }
  0x51   :  { %1465 = vmatprep.subr.bf16.mxu1 %v2204_v23  ;;  %v1825_v23 = vcombine.high %v2890_v21, %v2890_v21 }
  0x53   :  { %1425 = vmatpush1.bf16.msra.mxu0 %v2199_v24  ;;  %v2284_v24 = vld [vmem:[%s3177_s1 + $0x560] ss:$8 sps:$4 sm:$0xff]  }
  0x54   :  { %1426 = vmatprep.subr.bf16.mxu0 %v2207_v25  ;;  %1466 = vmatpush1.bf16.msra.mxu1 %v2202_v26  ;;  %v2292_v25 = vld [vmem:[%s3177_s1 + $0x554] ss:$8 sps:$4 sm:$0xff]   ;;  %v2287_v26 = vld [vmem:[%s3177_s1 + $0x450] ss:$8 sps:$4 sm:$0xff]  }
  0x55   :  { %1467 = vmatprep.subr.bf16.mxu1 %v2210_v27  ;;  %v2295_v27 = vld [vmem:[%s3177_s1 + $0x444] ss:$8 sps:$4 sm:$0xff]  }
  0x57   :  { %1427 = vmatpush1.bf16.msra.mxu0 %v2205_v28  ;;  %v2290_v28 = vld [vmem:[%s3177_s1 + $0x550] ss:$8 sps:$4 sm:$0xff]  }
  0x58   :  { %1428 = vmatprep.subr.bf16.mxu0 %v2213_v29  ;;  %1468 = vmatpush1.bf16.msra.mxu1 %v2208_v30  ;;  %v2298_v29 = vld [vmem:[%s3177_s1 + $0x544] ss:$8 sps:$4 sm:$0xff]   ;;  %v2293_v30 = vld [vmem:[%s3177_s1 + $0x440] ss:$8 sps:$4 sm:$0xff]  }
  0x59   :  { %1469 = vmatprep.subr.bf16.mxu1 %v2216_v31  ;;  %v2301_v31 = vld [vmem:[%s3177_s1 + $0x434] ss:$8 sps:$4 sm:$0xff]  }
  0x5b   :  { %1429 = vmatpush1.bf16.msra.mxu0 %v2211_v33  ;;  %v2304_v33 = vld [vmem:[%s3177_s1 + $0x534] ss:$8 sps:$4 sm:$0xff]  }
  0x5c   :  { %1430 = vmatprep.subr.bf16.mxu0 %v2219_v36  ;;  %1470 = vmatpush1.bf16.msra.mxu1 %v2214_v38  ;;  %v2302_v36 = vld [vmem:[%s3177_s1 + $0x530] ss:$8 sps:$4 sm:$0xff]   ;;  %v2305_v38 = vld [vmem:[%s3177_s1 + $0x420] ss:$8 sps:$4 sm:$0xff]  }
  0x5d   :  { %1471 = vmatprep.subr.bf16.mxu1 %v2222_v39  ;;  %v2313_v39 = vld [vmem:[%s3177_s1 + $0x414] ss:$8 sps:$4 sm:$0xff]  }
  0x5f   :  { %1431 = vmatpush1.bf16.msra.mxu0 %v2217_v40  ;;  %v2308_v40 = vld [vmem:[%s3177_s1 + $0x520] ss:$8 sps:$4 sm:$0xff]  }
  0x60   :  { %1432 = vmatprep.subr.bf16.mxu0 %v2225_v41  ;;  %1472 = vmatpush1.bf16.msra.mxu1 %v2220_v42  ;;  %v2316_v41 = vld [vmem:[%s3177_s1 + $0x514] ss:$8 sps:$4 sm:$0xff]   ;;  %v2311_v42 = vld [vmem:[%s3177_s1 + $0x410] ss:$8 sps:$4 sm:$0xff]  }
  0x61   :  { %1473 = vmatprep.subr.bf16.mxu1 %v2228_v43  ;;  %v2319_v43 = vld [vmem:[%s3177_s1 + $0x404] ss:$8 sps:$4 sm:$0xff]  }
  0x63   :  { %1433 = vmatpush2.bf16.msra.mxu0 %v2223_v44  ;;  %v2314_v44 = vld [vmem:[%s3177_s1 + $0x510] ss:$8 sps:$4 sm:$0xff]  }
  0x64   :  { %1434 = vmatprep.subr.bf16.mxu0 %v2231_v45  ;;  %1474 = vmatpush2.bf16.msra.mxu1 %v2226_v46  ;;  %v2322_v45 = vld [vmem:[%s3177_s1 + $0x504] ss:$8 sps:$4 sm:$0xff]   ;;  %v2317_v46 = vld [vmem:[%s3177_s1 + $0x400] ss:$8 sps:$4 sm:$0xff]  }
  0x65   :  { %1475 = vmatprep.subr.bf16.mxu1 %v2234_v47  ;;  %v2325_v47 = vld [vmem:[%s3177_s1 + $0x4f4] ss:$8 sps:$4 sm:$0xff]  }
  0x67   :  { %1435 = vmatpush2.bf16.msra.mxu0 %v2229_v48  ;;  %v2320_v48 = vld [vmem:[%s3177_s1 + $0x500] ss:$8 sps:$4 sm:$0xff]  }
  0x68   :  { %1436 = vmatprep.subr.bf16.mxu0 %v2237_v49  ;;  %1476 = vmatpush2.bf16.msra.mxu1 %v2232_v50  ;;  %v2328_v49 = vld [vmem:[%s3177_s1 + $0x5f4] ss:$8 sps:$4 sm:$0xff]   ;;  %v2323_v50 = vld [vmem:[%s3177_s1 + $0x4f0] ss:$8 sps:$4 sm:$0xff]  }
  0x69   :  { %1477 = vmatprep.subr.bf16.mxu1 %v2240_v51  ;;  %v2331_v51 = vld [vmem:[%s3177_s1 + $0x4e4] ss:$8 sps:$4 sm:$0xff]  }
  0x6b   :  { %1437 = vmatpush2.bf16.msra.mxu0 %v2235_v52  ;;  %v2326_v52 = vld [vmem:[%s3177_s1 + $0x5f0] ss:$8 sps:$4 sm:$0xff]  }
  0x6c   :  { %1438 = vmatprep.subr.bf16.mxu0 %v2243_v53  ;;  %1478 = vmatpush2.bf16.msra.mxu1 %v2238_v54  ;;  %v2334_v53 = vld [vmem:[%s3177_s1 + $0x5e4] ss:$8 sps:$4 sm:$0xff]   ;;  %v2329_v54 = vld [vmem:[%s3177_s1 + $0x4e0] ss:$8 sps:$4 sm:$0xff]  }
  0x6d   :  { %1479 = vmatprep.subr.bf16.mxu1 %v2246_v55  ;;  %v2337_v55 = vld [vmem:[%s3177_s1 + $0x4d4] ss:$8 sps:$4 sm:$0xff]  }
  0x6f   :  { %1439 = vmatpush2.bf16.msra.mxu0 %v2241_v56  ;;  %v2332_v56 = vld [vmem:[%s3177_s1 + $0x5e0] ss:$8 sps:$4 sm:$0xff]  }
  0x70   :  { %1440 = vmatprep.subr.bf16.mxu0 %v2249_v57  ;;  %1480 = vmatpush2.bf16.msra.mxu1 %v2244_v58  ;;  %v2340_v57 = vld [vmem:[%s3177_s1 + $0x5d4] ss:$8 sps:$4 sm:$0xff]   ;;  %v2335_v58 = vld [vmem:[%s3177_s1 + $0x4d0] ss:$8 sps:$4 sm:$0xff]  }
  0x71   :  { %1481 = vmatprep.subr.bf16.mxu1 %v2252_v59  ;;  %v2343_v59 = vld [vmem:[%s3177_s1 + $0x4c4] ss:$8 sps:$4 sm:$0xff]  }
  0x73   :  { %1441 = vmatpush2.bf16.msra.mxu0 %v2247_v60  ;;  %v2338_v60 = vld [vmem:[%s3177_s1 + $0x5d0] ss:$8 sps:$4 sm:$0xff]  }
  0x74   :  { %1442 = vmatprep.subr.bf16.mxu0 %v2255_v61  ;;  %1482 = vmatpush2.bf16.msra.mxu1 %v2250_v62  ;;  %v2346_v61 = vld [vmem:[%s3177_s1 + $0x5c4] ss:$8 sps:$4 sm:$0xff]   ;;  %v2341_v62 = vld [vmem:[%s3177_s1 + $0x4c0] ss:$8 sps:$4 sm:$0xff]  }
  0x75   :  { %1483 = vmatprep.subr.bf16.mxu1 %v2258_v63  ;;  %v2349_v63 = vld [vmem:[%s3177_s1 + $0x4b4] ss:$8 sps:$4 sm:$0xff]  }
  0x77   :  { %1443 = vmatpush2.bf16.msra.mxu0 %v2253_v0  ;;  %v2344_v0 = vld [vmem:[%s3177_s1 + $0x5c0] ss:$8 sps:$4 sm:$0xff]  }
  0x78   :  { %1444 = vmatprep.subr.bf16.mxu0 %v2261_v1  ;;  %1484 = vmatpush2.bf16.msra.mxu1 %v2256_v2  ;;  %v2352_v1 = vld [vmem:[%s3177_s1 + $0x5b4] ss:$8 sps:$4 sm:$0xff]   ;;  %v2347_v2 = vld [vmem:[%s3177_s1 + $0x4b0] ss:$8 sps:$4 sm:$0xff]  }
  0x79   :  { %1485 = vmatprep.subr.bf16.mxu1 %v2264_v3  ;;  %v2355_v3 = vld [vmem:[%s3177_s1 + $0x4a4] ss:$8 sps:$4 sm:$0xff]  }
  0x7b   :  { %1445 = vmatpush2.bf16.msra.mxu0 %v2259_v4  ;;  %v2350_v4 = vld [vmem:[%s3177_s1 + $0x5b0] ss:$8 sps:$4 sm:$0xff]  }
  0x7c   :  { %1446 = vmatprep.subr.bf16.mxu0 %v2267_v5  ;;  %1486 = vmatpush2.bf16.msra.mxu1 %v2262_v6  ;;  %v2358_v5 = vld [vmem:[%s3177_s1 + $0x5a4] ss:$8 sps:$4 sm:$0xff]   ;;  %v2353_v6 = vld [vmem:[%s3177_s1 + $0x4a0] ss:$8 sps:$4 sm:$0xff]  }
  0x7d   :  { %1487 = vmatprep.subr.bf16.mxu1 %v2270_v7  ;;  %v2361_v7 = vld [vmem:[%s3177_s1 + $0x494] ss:$8 sps:$4 sm:$0xff]  }
  0x7f   :  { %1447 = vmatpush2.bf16.msra.mxu0 %v2265_v8  ;;  %v2356_v8 = vld [vmem:[%s3177_s1 + $0x5a0] ss:$8 sps:$4 sm:$0xff]  }
  0x80   :  { %1498 = vmatprep.subr.bf16.mxu0 %v2275_v9  ;;  %1488 = vmatpush2.bf16.msra.mxu1 %v2268_v10  ;;  %v2364_v9 = vld [vmem:[%s3177_s1 + $0x594] ss:$8 sps:$4 sm:$0xff]   ;;  %v2359_v10 = vld [vmem:[%s3177_s1 + $0x490] ss:$8 sps:$4 sm:$0xff]  }
  0x81   :  { %1539 = vmatprep.subr.bf16.mxu1 %v2280_v12  ;;  %v2362_v12 = vld [vmem:[%s3177_s1 + $0x590] ss:$8 sps:$4 sm:$0xff]  }
  0x82   :  { %1449 = vmatmul.mubr.bf16.vlgmr.msra.gmra.mxu0 %v1818_v11  ;;  %v2367_v11 = vld [vmem:[%s3177_s1 + $0x484] ss:$8 sps:$4 sm:$0xff]  }
  0x83   :  { %1499 = vmatpush1.bf16.msra.mxu0 %v2273_v13  ;;  %1490 = vmatmul.mubr.bf16.vlgmr.msra.gmra.mxu1 %v1820_v14  ;;  %v2370_v13 = vld [vmem:[%s3177_s1 + $0x584] ss:$8 sps:$4 sm:$0xff]   ;;  %v2365_v14 = vld [vmem:[%s3177_s1 + $0x480] ss:$8 sps:$4 sm:$0xff]  }
  0x84   :  { %1500 = vmatprep.subr.bf16.mxu0 %v2283_v15  ;;  %1540 = vmatpush1.bf16.msra.mxu1 %v2278_v16  ;;  %v2375_v15 = vld [vmem:[%s3177_s1 + $0x674] ss:$8 sps:$4 sm:$0xff]   ;;  %v2368_v16 = vld [vmem:[%s3177_s1 + $0x580] ss:$8 sps:$4 sm:$0xff]  }
  0x85   :  { %1530 = vmatprep.mubr.bf16.mxu0 %v1823_v20  ;;  %1541 = vmatprep.subr.bf16.mxu1 %v2286_v19  ;;  %v2373_v19 = vld [vmem:[%s3177_s1 + $0x670] ss:$8 sps:$4 sm:$0xff]   ;;  %v1824_v20 = vcombine.low %v2890_v21, %v2890_v21 }
  0x86   :  { %1571 = vmatprep.mubr.bf16.mxu1 %v1825_v23  ;;  %v2420_v23 = vmov 0   ;;  %v2381_v21 = vld [vmem:[%s3177_s1 + $0x650] ss:$8 sps:$4 sm:$0xff]  }
  0x87   :  { %1501 = vmatpush1.bf16.msra.mxu0 %v2281_v18  ;;  %v1822_v18 = vcombine.low %v2877_v17, %v2877_v17  ;;  %v2378_v17 = vld [vmem:[%s3177_s1 + $0x660] ss:$8 sps:$4 sm:$0xff]  }
  0x88   :  { %1502 = vmatprep.subr.bf16.mxu0 %v2289_v22  ;;  %1542 = vmatpush1.bf16.msra.mxu1 %v2284_v24  ;;  %v2380_v22 = vld [vmem:[%s3177_s1 + $0x664] ss:$8 sps:$4 sm:$0xff]   ;;  %v2383_v24 = vld [vmem:[%s3177_s1 + $0x654] ss:$8 sps:$4 sm:$0xff]  }
  0x89   :  { %1543 = vmatprep.subr.bf16.mxu1 %v2292_v25  ;;  %v2386_v25 = vld [vmem:[%s3177_s1 + $0x644] ss:$8 sps:$4 sm:$0xff]  }
  0x8b   :  { %1503 = vmatpush1.bf16.msra.mxu0 %v2287_v26  ;;  %v2384_v26 = vld [vmem:[%s3177_s1 + $0x640] ss:$8 sps:$4 sm:$0xff]  }
  0x8c   :  { %1504 = vmatprep.subr.bf16.mxu0 %v2295_v27  ;;  %1544 = vmatpush1.bf16.msra.mxu1 %v2290_v28  ;;  %v2389_v27 = vld [vmem:[%s3177_s1 + $0x634] ss:$8 sps:$4 sm:$0xff]   ;;  %v2387_v28 = vld [vmem:[%s3177_s1 + $0x630] ss:$8 sps:$4 sm:$0xff]  }
  0x8d   :  { %1545 = vmatprep.subr.bf16.mxu1 %v2298_v29  ;;  %v2392_v29 = vld [vmem:[%s3177_s1 + $0x624] ss:$8 sps:$4 sm:$0xff]  }
  0x8f   :  { %1505 = vmatpush1.bf16.msra.mxu0 %v2293_v30  ;;  %v2390_v30 = vld [vmem:[%s3177_s1 + $0x620] ss:$8 sps:$4 sm:$0xff]  }
  0x90   :  { %1506 = vmatprep.subr.bf16.mxu0 %v2301_v31  ;;  %1546 = vmatpush1.bf16.msra.mxu1 %v2296_v32  ;;  %v2395_v31 = vld [vmem:[%s3177_s1 + $0x614] ss:$8 sps:$4 sm:$0xff]   ;;  %v2393_v32 = vld [vmem:[%s3177_s1 + $0x610] ss:$8 sps:$4 sm:$0xff]  }
  0x91   :  { %1547 = vmatprep.subr.bf16.mxu1 %v2304_v33  ;;  %v2398_v33 = vld [vmem:[%s3177_s1 + $0x604] ss:$8 sps:$4 sm:$0xff]  }
  0x93   :  { %1507 = vmatpush1.bf16.msra.mxu0 %v2299_v34  ;;  %v2396_v34 = vld [vmem:[%s3177_s1 + $0x600] ss:$8 sps:$4 sm:$0xff]  }
  0x94   :  { %1508 = vmatprep.subr.bf16.mxu0 %v2307_v35  ;;  %1548 = vmatpush1.bf16.msra.mxu1 %v2302_v36  ;;  %v2399_v35 = vld [vmem:[%s3178_s0 + $0x30] ss:$0 sps:$4 sm:$0xff]   ;;  %v238_v36 = vlaneseq }
  0x95   :  { %1549 = vmatprep.subr.bf16.mxu1 %v2310_v37 }
  0x96   :  { %v239_v37 = vshrl.u32 %v238_v36, 7 }
  0x97   :  { %1509 = vmatpush1.bf16.msra.mxu0 %v2305_v38 }
  0x98   :  { %1510 = vmatprep.subr.bf16.mxu0 %v2313_v39  ;;  %1550 = vmatpush1.bf16.msra.mxu1 %v2308_v40  ;;  %v240_v38 = vsub.s32 0, %v239_v37  ;;  %v236_v39 = vld [vmem:[%s3179_s2] sm:$0x3]  ;;  %v244_v40 = vsub.s32 1, %v239_v37 }
  0x99   :  { %1551 = vmatprep.subr.bf16.mxu1 %v2316_v41 }
  0x9a   :  { %v241_v41 = vrot.slane %v236_v39, %v240_v38 }
  0x9b   :  { %1511 = vmatpush1.bf16.msra.mxu0 %v2311_v42  ;;  %v245_v42 = vrot.slane %v236_v39, %v244_v40 }
  0x9c   :  { %1512 = vmatprep.subr.bf16.mxu0 %v2319_v43  ;;  %1552 = vmatpush1.bf16.msra.mxu1 %v2314_v44 }
  0x9d   :  { %1553 = vmatprep.subr.bf16.mxu1 %v2322_v45 }
  0x9f   :  { %1513 = vmatpush1.bf16.msra.mxu0 %v2317_v46 }
  0xa0   :  { %1514 = vmatprep.subr.bf16.mxu0 %v2325_v47  ;;  %1554 = vmatpush1.bf16.msra.mxu1 %v2320_v48 }
  0xa1   :  { %1555 = vmatprep.subr.bf16.mxu1 %v2328_v49 }
  0xa3   :  { %1515 = vmatpush2.bf16.msra.mxu0 %v2323_v50 }
  0xa4   :  { %1516 = vmatprep.subr.bf16.mxu0 %v2331_v51  ;;  %1556 = vmatpush2.bf16.msra.mxu1 %v2326_v52 }
  0xa5   :  { %1557 = vmatprep.subr.bf16.mxu1 %v2334_v53 }
  0xa7   :  { %1517 = vmatpush2.bf16.msra.mxu0 %v2329_v54  ;;  %v2400_v54 = vld [vmem:[%s3180_s3 + $0x78] sm:$0xff]  }
  0xa8   :  { %1518 = vmatprep.subr.bf16.mxu0 %v2337_v55  ;;  %1558 = vmatpush2.bf16.msra.mxu1 %v2332_v56  ;;  %v2401_v56 = vld [vmem:[%s3180_s3 + $0x38] sm:$0xff]  }
  0xa9   :  { %1559 = vmatprep.subr.bf16.mxu1 %v2340_v57  ;;  %v2402_v57 = vld [vmem:[%s3180_s3 + $0x70] sm:$0xff]  }
  0xab   :  { %1519 = vmatpush2.bf16.msra.mxu0 %v2335_v58  ;;  %v2403_v58 = vld [vmem:[%s3180_s3 + $0x30] sm:$0xff]  }
  0xac   :  { %1520 = vmatprep.subr.bf16.mxu0 %v2343_v59  ;;  %1560 = vmatpush2.bf16.msra.mxu1 %v2338_v60  ;;  %v2404_v59 = vld [vmem:[%s3180_s3 + $0x68] sm:$0xff]  }
  0xad   :  { %1561 = vmatprep.subr.bf16.mxu1 %v2346_v61  ;;  %v2405_v60 = vld [vmem:[%s3180_s3 + $0x28] sm:$0xff]   ;;  %v2406_v61 = vld [vmem:[%s3180_s3 + $0x60] sm:$0xff]  }
  0xaf   :  { %1521 = vmatpush2.bf16.msra.mxu0 %v2341_v62  ;;  %v2407_v62 = vld [vmem:[%s3180_s3 + $0x20] sm:$0xff]  }
  0xb0   :  { %1522 = vmatprep.subr.bf16.mxu0 %v2349_v63  ;;  %1562 = vmatpush2.bf16.msra.mxu1 %v2344_v0  ;;  %v2408_v63 = vld [vmem:[%s3180_s3 + $0x58] sm:$0xff]  }
  0xb1   :  { %1563 = vmatprep.subr.bf16.mxu1 %v2352_v1  ;;  %v2409_v0 = vld [vmem:[%s3180_s3 + $0x18] sm:$0xff]   ;;  %v2410_v1 = vld [vmem:[%s3180_s3 + $0x50] sm:$0xff]  }
  0xb3   :  { %1523 = vmatpush2.bf16.msra.mxu0 %v2347_v2  ;;  %v2411_v2 = vld [vmem:[%s3180_s3 + $0x10] sm:$0xff]  }
  0xb4   :  { %1524 = vmatprep.subr.bf16.mxu0 %v2355_v3  ;;  %1564 = vmatpush2.bf16.msra.mxu1 %v2350_v4  ;;  %v2412_v3 = vld [vmem:[%s3180_s3 + $0x48] sm:$0xff]  }
  0xb5   :  { %1565 = vmatprep.subr.bf16.mxu1 %v2358_v5  ;;  %v2413_v4 = vld [vmem:[%s3180_s3 + $0x8] sm:$0xff]   ;;  %v2414_v5 = vld [vmem:[%s3180_s3 + $0x40] sm:$0xff]  }
  0xb7   :  { %1525 = vmatpush2.bf16.msra.mxu0 %v2353_v6  ;;  %v2415_v6 = vld [vmem:[%s3180_s3] sm:$0xff]  }
  0xb8   :  { %1526 = vmatprep.subr.bf16.mxu0 %v2361_v7  ;;  %1566 = vmatpush2.bf16.msra.mxu1 %v2356_v8 }
  0xb9   :  { %1567 = vmatprep.subr.bf16.mxu1 %v2364_v9 }
  0xbb   :  { %1527 = vmatpush2.bf16.msra.mxu0 %v2359_v10 }
  0xbc   :  { %1528 = vmatprep.subr.bf16.mxu0 %v2367_v11  ;;  %1568 = vmatpush2.bf16.msra.mxu1 %v2362_v12 }
  0xbd   :  { %1569 = vmatprep.subr.bf16.mxu1 %v2370_v13 }
  0xbf   :  { %1529 = vmatpush2.bf16.msra.mxu0 %v2365_v14 }
  0xc0   :  { %1580 = vmatprep.subr.bf16.mxu0 %v2375_v15  ;;  %1570 = vmatpush2.bf16.msra.mxu1 %v2368_v16 }
  0xc1   :  { %2052 = vmatprep.subr.bf16.mxu1 %v2400_v54 }
  0xc2   :  { %1531 = vmatmul.mubr.bf16.vlgmr.msra.gmra.mxu0 %v1822_v18 }
  0xc3   :  { %1581 = vmatpush1.bf16.msra.mxu0 %v2373_v19  ;;  %1612 = vmatprep.mubr.bf16.mxu0 %v2420_v23 }
  0xc4   :  { %1572 = vmatmul.mubr.bf16.vlgmr.msra.gmra.mxu1 %v1824_v20  ;;  %1582 = vmatprep.subr.bf16.mxu0 %v2380_v22 }
  0xc5   :  { %2053 = vmatpush3.bf16.msra.mxu1 %v2401_v56 }
  0xc6   :  { %2054 = vmatprep.subr.bf16.mxu1 %v2402_v57 }
  0xc7   :  { %1583 = vmatpush1.bf16.msra.mxu0 %v2378_v17 }
  0xc8   :  { %1584 = vmatprep.subr.bf16.mxu0 %v2383_v24 }
  0xc9   :  { %2055 = vmatpush3.bf16.msra.mxu1 %v2403_v58 }
  0xca   :  { %2056 = vmatprep.subr.bf16.mxu1 %v2404_v59 }
  0xcb   :  { %1585 = vmatpush1.bf16.msra.mxu0 %v2381_v21 }
  0xcc   :  { %1586 = vmatprep.subr.bf16.mxu0 %v2386_v25 }
  0xcd   :  { %2057 = vmatpush3.bf16.msra.mxu1 %v2405_v60 }
  0xce   :  { %2058 = vmatprep.subr.bf16.mxu1 %v2406_v61 }
  0xcf   :  { %1587 = vmatpush1.bf16.msra.mxu0 %v2384_v26 }
  0xd0   :  { %1588 = vmatprep.subr.bf16.mxu0 %v2389_v27 }
  0xd1   :  { %2059 = vmatpush3.bf16.msra.mxu1 %v2407_v62 }
  0xd2   :  { %2060 = vmatprep.subr.bf16.mxu1 %v2408_v63 }
  0xd3   :  { %1589 = vmatpush1.bf16.msra.mxu0 %v2387_v28 }
  0xd4   :  { %1590 = vmatprep.subr.bf16.mxu0 %v2392_v29 }
  0xd5   :  { %2061 = vmatpush3.bf16.msra.mxu1 %v2409_v0 }
  0xd6   :  { %2062 = vmatprep.subr.bf16.mxu1 %v2410_v1 }
  0xd7   :  { %1591 = vmatpush1.bf16.msra.mxu0 %v2390_v30 }
  0xd8   :  { %1592 = vmatprep.subr.bf16.mxu0 %v2395_v31 }
  0xd9   :  { %2063 = vmatpush3.bf16.msra.mxu1 %v2411_v2 }
  0xda   :  { %2064 = vmatprep.subr.bf16.mxu1 %v2412_v3 }
  0xdb   :  { %1593 = vmatpush1.bf16.msra.mxu0 %v2393_v32 }
  0xdc   :  { %1594 = vmatprep.subr.bf16.mxu0 %v2398_v33 }
  0xdd   :  { %2065 = vmatpush3.bf16.msra.mxu1 %v2413_v4 }
  0xde   :  { %2066 = vmatprep.subr.bf16.mxu1 %v2414_v5 }
  0xdf   :  { %1595 = vmatpush1.bf16.msra.mxu0 %v2396_v34 }
  0xe1   :  { %2067 = vmatpush3.bf16.msra.mxu1 %v2415_v6 }
  0xe2   :  { %1613 = vmatmul.mubr.bf16.vlgmr.msra.gmra.mxu0 %v2399_v35 }
 0x102   :  { %v1368_v43 = vpop.f32.mrf.mxu0 }
 0x103   :  { %v1369_v44 = vadd.f32 %v1368_v43, %v241_v41  ;;  %v1409_v46 = vpop.f32.mrf.mxu1  ;;  %v2035_v43 = vld [vmem:[%s3181_s4] ss:$0 sm:$0xff] }
 0x104   :  { %v1370_v45 = vpop.f32.mrf.mxu0 }
 0x105   :  { %v1371_v47 = vadd.f32 %v1370_v45, %v245_v42  ;;  %v1410_v48 = vadd.f32 %v1409_v46, %v1369_v44  ;;  %v1411_v50 = vpop.f32.mrf.mxu1 }
 0x106   :  { %v1372_v49 = vpop.f32.mrf.mxu0 }
 0x107   :  { %v1412_v51 = vadd.f32 %v1411_v50, %v1371_v47  ;;  %v1413_v53 = vpop.f32.mrf.mxu1 }
 0x108   :  { %v1373_v52 = vpop.f32.mrf.mxu0 }
 0x109   :  { %v1414_v55 = vpop.f32.mrf.mxu1 }
 0x142   :  { %v1450_v7 = vpop.f32.mrf.mxu0 }
 0x143   :  { %v1451_v8 = vadd.f32 %v1450_v7, %v1410_v48  ;;  %v1491_v10 = vpop.f32.mrf.mxu1 }
 0x144   :  { %v1452_v9 = vpop.f32.mrf.mxu0 }
 0x145   :  { %v1453_v11 = vadd.f32 %v1452_v9, %v1412_v51  ;;  %v1492_v12 = vadd.f32 %v1491_v10, %v1451_v8  ;;  %v1493_v14 = vpop.f32.mrf.mxu1 }
 0x146   :  { %v1454_v13 = vpop.f32.mrf.mxu0 }
 0x147   :  { %v1494_v15 = vadd.f32 %v1493_v14, %v1453_v11  ;;  %v1495_v18 = vpop.f32.mrf.mxu1 }
 0x148   :  { %v1455_v16 = vpop.f32.mrf.mxu0 }
 0x149   :  { %v1496_v19 = vpop.f32.mrf.mxu1 }
 0x182   :  { %v1532_v20 = vpop.f32.mrf.mxu0 }
 0x183   :  { %v1533_v27 = vadd.f32 %v1532_v20, %v1492_v12 }
 0x184   :  { %v1534_v22 = vpop.f32.mrf.mxu0  ;;  %v1573_v17 = vpop.f32.mrf.mxu1 }
 0x185   :  { %v1535_v28 = vadd.f32 %v1534_v22, %v1494_v15  ;;  %v1574_v29 = vadd.f32 %v1573_v17, %v1533_v27 }
 0x186   :  { %v1536_v23 = vpop.f32.mrf.mxu0  ;;  %v1575_v24 = vpop.f32.mrf.mxu1 }
 0x187   :  { %v1576_v31 = vadd.f32 %v1575_v24, %v1535_v28 }
 0x188   :  { %v1537_v21 = vpop.f32.mrf.mxu0  ;;  %v1577_v25 = vpop.f32.mrf.mxu1 }
 0x18a   :  { %v1578_v26 = vpop.f32.mrf.mxu1 }
 0x1a2   :  { %v1614_v30 = vpop.f32.mrf.mxu0 }
 0x1a3   :  { %v1615_v32 = vadd.f32 %v1614_v30, %v1574_v29 }
 0x1a4   :  { %v1616_v33 = vpop.f32.mrf.mxu0 }
 0x1a5   :  { %v1617_v34 = vadd.f32 %v1616_v33, %v1576_v31  ;;  %v1621_v35 = vmax.f32 %v1615_v32, 0.0 }
 0x1a6   :  { %v1618_v36 = vpop.f32.mrf.mxu0 }
 0x1a7   :  { %v1622_v37 = vmax.f32 %v1617_v34, 0.0  ;;  %v1623_v40 = vpack.c.bf16 %v1621_v35, %v1621_v35 }
 0x1a8   :  { %v1619_v38 = vpop.f32.mrf.mxu0 }
 0x1a9   :  { %v1624_v39 = vpack.c.bf16 %v1622_v37, %v1622_v37 }
 0x1ab   :  { %1792 = vmatprep.mubr.bf16.mxu1 %v1624_v39 }
 0x1ac   :  { %1793 = vmatmul.mubr.bf16.vlgmr.msra.gmra.mxu1 %v1623_v40 }
 0x26c   :  { %v2068_v41 = vpop.f32.mrf.mxu1 }
 0x26e   :  { %v2069_v42 = vpop.f32.mrf.mxu1 }
 0x26f   :  { %v2070_v44 = vadd.f32 %v2069_v42, %v2068_v41 }
 0x270   :  { %v2071_v45 = vpop.f32.mrf.mxu1 }
 0x271   :  { %v1795_v46 = vadd.f32 %v2070_v44, %v2035_v43 }
 0x272   :  { %v2072_v47 = vpop.f32.mrf.mxu1 }
 0x273   :  { %1800 = vmax.xlane.f32.xlu0 %v1795_v46 }
 0x2fc   :  { %v1801_v48 = vpop.xlane.xlu0 %1800 }
 0x2fd   :  { %v1802_v49 = vsub.f32 %v1795_v46, %v1801_v48 }
 0x2ff   :  { %v1803_v50 = vmul.f32 1.442695, %v1802_v49 }
 0x301   :  { %2416 = vpow2.f32 %v1803_v50 }
 0x30e   :  { %v2417_v51 = vpop.eup %2416 }
 0x30f   :  { %1805 = vadd.xlane.f32.xlu0 %v2417_v51 }
 0x398   :  { %v1806_v52 = vpop.xlane.xlu0 %1805 }
 0x399   :  { %2418 = vrcp.f32 %v1806_v52 }
 0x3a6   :  { %v2419_v53 = vpop.eup %2418 }
 0x3a7   :  { %v1808_v54 = vmul.f32 %v2419_v53, %v2417_v51 }
 0x3a9   :  { %1809 = vst [vmem:[%s3182_s5] sm:$0xff] %v1808_v54 }

</bundles_post_ra>
